<compile_context>
chip_gen: v5e
topology: v5e:2x2
jax: 0.10.0
libtpu: 0.0.40
codegen_flags: <defaults>
</compile_context>

<pallas_src>
import math

import jax
import jax.numpy as jnp
from jax import lax
from jax.experimental import pallas as pl
from jax.experimental.pallas import tpu as pltpu


# ---------------------------------------------------------------------------
# Fused MHA kernel factory.  `mode` selects how many input slabs we receive:
#   "self"    : x                      (query is key is value)  -> 1 QKV dot
#   "kv"      : xq, xkv                (key is value)           -> 2 dots
#   "general" : xq, xk, xv                                      -> 3 dots
# ---------------------------------------------------------------------------
def make_mha_kernel(mode, num_heads, head_dim, bp, sq, sk):
    E = num_heads * head_dim

    def attention_and_out(q, k, v, wo, bo, o_ref):
        # q: (bp*sq, E), k/v: (bp*sk, E) -- all f32; wo bf16 (E,E); bo f32 (1,E)
        for b in range(bp):
            rq, rk = b * sq, b * sk
            out_b = jnp.zeros((sq, E), jnp.float32)
            for h in range(num_heads):
                lo = h * head_dim
                qh = q[rq:rq + sq, lo:lo + head_dim].astype(jnp.bfloat16)
                kh = k[rk:rk + sk, lo:lo + head_dim].astype(jnp.bfloat16)
                vh = v[rk:rk + sk, lo:lo + head_dim].astype(jnp.bfloat16)

                # contract last axes directly -> no explicit transpose of kh.
                # 1/sqrt(Dh) is already folded into the Q weights.
                s = lax.dot_general(qh, kh, (((1,), (1,)), ((), ())),
                                    preferred_element_type=jnp.float32)

                m = jnp.max(s, axis=-1, keepdims=True)
                p = jnp.exp(s - m)
                p = p * pl.reciprocal(jnp.sum(p, axis=-1, keepdims=True),
                                      approx=True)

                ctx = jnp.dot(p.astype(jnp.bfloat16), vh,
                              preferred_element_type=jnp.float32)   # (sq, Dh)

                # Accumulate straight into the output projection: no lane
                # concat of heads, just a (Dh,E) row-slice of Wo per head.
                out_b = out_b + jnp.dot(ctx.astype(jnp.bfloat16),
                                        wo[lo:lo + head_dim, :],
                                        preferred_element_type=jnp.float32)
            o_ref[rq:rq + sq, :] = (out_b + bo).astype(o_ref.dtype)

    if mode == "self":
        def kernel(x_ref, w_ref, b_ref, wo_ref, bo_ref, o_ref):
            x = x_ref[...].astype(jnp.bfloat16)
            w = w_ref[...]
            b = b_ref[...]
            qkv = jnp.dot(x, w, preferred_element_type=jnp.float32) + b
            attention_and_out(qkv[:, :E], qkv[:, E:2 * E], qkv[:, 2 * E:],
                              wo_ref[...], bo_ref[...], o_ref)
    elif mode == "kv":
        def kernel(xq_ref, xkv_ref, w_ref, b_ref, wo_ref, bo_ref, o_ref):
            xq = xq_ref[...].astype(jnp.bfloat16)
            xkv = xkv_ref[...].astype(jnp.bfloat16)
            w = w_ref[...]
            b = b_ref[...]
            q = jnp.dot(xq, w[:, :E],
                        preferred_element_type=jnp.float32) + b[:, :E]
            kv = jnp.dot(xkv, w[:, E:],
                         preferred_element_type=jnp.float32) + b[:, E:]
            attention_and_out(q, kv[:, :E], kv[:, E:],
                              wo_ref[...], bo_ref[...], o_ref)
    else:
        def kernel(xq_ref, xk_ref, xv_ref, w_ref, b_ref, wo_ref, bo_ref, o_ref):
            xq = xq_ref[...].astype(jnp.bfloat16)
            xk = xk_ref[...].astype(jnp.bfloat16)
            xv = xv_ref[...].astype(jnp.bfloat16)
            w = w_ref[...]
            b = b_ref[...]
            q = jnp.dot(xq, w[:, :E],
                        preferred_element_type=jnp.float32) + b[:, :E]
            k = jnp.dot(xk, w[:, E:2 * E],
                        preferred_element_type=jnp.float32) + b[:, E:2 * E]
            v = jnp.dot(xv, w[:, 2 * E:],
                        preferred_element_type=jnp.float32) + b[:, 2 * E:]
            attention_and_out(q, k, v, wo_ref[...], bo_ref[...], o_ref)

    return kernel


def _num_grid_steps(batch):
    """2-way grid only on 2-TensorCore chips (v7x); single step elsewhere."""
    try:
        kind = jax.devices()[0].device_kind.lower()
    except Exception:
        kind = ""
    two_tc = ("v7" in kind) or ("7x" in kind)
    return 2 if (two_tc and batch >= 2 and batch % 2 == 0) else 1


def mha_forward(mode, query, key, value, w_qkv, b_qkv, wo, bo, num_heads):
    """query: (B,Sq,E); key/value: (B,Sk,E); w_qkv: (E,3E) bf16; b_qkv: (1,3E)."""
    B, Sq, E = query.shape
    Sk = key.shape[1]
    head_dim = E // num_heads

    G = _num_grid_steps(B)       # 1 on v5e/v6e (single TC), 2 on v7x when B even
    bp = B // G                  # batch elements handled per grid step

    # Fold batch into rows (free, contiguous reshape) -> wide projection matmuls.
    q2 = query.reshape(B * Sq, E)
    row_q = pl.BlockSpec((bp * Sq, E), lambda g: (g, 0))
    row_k = pl.BlockSpec((bp * Sk, E), lambda g: (g, 0))

    if mode == "self":
        inputs = (q2,)
        x_specs = [row_q]
    elif mode == "kv":
        inputs = (q2, key.reshape(B * Sk, E))
        x_specs = [row_q, row_k]
    else:
        inputs = (q2, key.reshape(B * Sk, E), value.reshape(B * Sk, E))
        x_specs = [row_q, row_k, row_k]

    w_spec = pl.BlockSpec((E, 3 * E), lambda g: (0, 0))
    b_spec = pl.BlockSpec((1, 3 * E), lambda g: (0, 0))
    wo_spec = pl.BlockSpec((E, E), lambda g: (0, 0))
    bo_spec = pl.BlockSpec((1, E), lambda g: (0, 0))

    # Tiny-but-correct cost estimate: this kernel is launch/DMA-overhead bound;
    # tell the XLA scheduler it is cheap so it can overlap surrounding ops.
    rows_q, rows_k = B * Sq, B * Sk
    flops = (2 * rows_q * E * E + 4 * rows_k * E * E       # QKV projections
             + 4 * B * num_heads * Sq * Sk * head_dim      # scores + p@v
             + 2 * rows_q * E * E)                         # output projection
    transcendentals = B * num_heads * Sq * (Sk + 1)        # exp + reciprocal
    bytes_accessed = (4 * (2 * rows_q + 2 * rows_k) * E    # f32 activations in/out
                      + 2 * (3 * E * E + E * E)            # bf16 weights
                      + 4 * (3 * E + E))                   # f32 biases

    out2 = pl.pallas_call(
        make_mha_kernel(mode, num_heads, head_dim, bp, Sq, Sk),
        out_shape=jax.ShapeDtypeStruct((B * Sq, E), jnp.float32),
        grid_spec=pltpu.PrefetchScalarGridSpec(
            num_scalar_prefetch=0,
            grid=(G,),
            in_specs=x_specs + [w_spec, b_spec, wo_spec, bo_spec],
            out_specs=pl.BlockSpec((bp * Sq, E), lambda g: (g, 0)),
        ),
        compiler_params=pltpu.CompilerParams(
            dimension_semantics=("parallel",)),
        cost_estimate=pl.CostEstimate(flops=flops,
                                      transcendentals=transcendentals,
                                      bytes_accessed=bytes_accessed),
    )(*inputs, w_qkv, b_qkv, wo, bo)

    return out2.reshape(B, Sq, E)


# ---------------------------------------------------------------------------
# Module wrapper (parameter setup is plain JAX glue)
# ---------------------------------------------------------------------------
class MultiHeadAttentionPallas:
    def __init__(self, embed_dim, num_heads, key):
        self.num_heads = num_heads
        self.head_dim = embed_dim // num_heads
        self.all_head_size = self.head_dim * num_heads
        self.embed_dim = embed_dim

        keys = jax.random.split(key, 8)
        bound = 1.0 / math.sqrt(embed_dim)

        def init_w(k):  # stored (in, out) so forward is x @ W + b
            return jax.random.uniform(
                k, (embed_dim, self.all_head_size),
                minval=-bound, maxval=bound, dtype=jnp.float32)

        def init_b(k):
            return jax.random.uniform(
                k, (self.all_head_size,),
                minval=-bound, maxval=bound, dtype=jnp.float32)

        wq, bq = init_w(keys[0]), init_b(keys[1])
        wk, bk = init_w(keys[2]), init_b(keys[3])
        wv, bv = init_w(keys[4]), init_b(keys[5])
        wo, bo = init_w(keys[6]), init_b(keys[7])

        # Fold the 1/sqrt(Dh) softmax scale into the Q projection (one-time,
        # host-side parameter rescale, zero per-call cost).
        scale = 1.0 / math.sqrt(self.head_dim)
        w_qkv = jnp.concatenate([wq * scale, wk, wv], axis=1)   # (E, 3E) lane-dense
        b_qkv = jnp.concatenate([bq * scale, bk, bv])[None, :]  # (1, 3E)

        # bf16 matmul operands (native MXU path on v6e/v7x); biases/softmax/
        # accumulation stay f32 (v5e-safe elementwise math).
        self.w_qkv = w_qkv.astype(jnp.bfloat16)
        self.b_qkv = b_qkv
        self.wo = wo.astype(jnp.bfloat16)
        self.bo = bo.reshape(1, -1)

    def __call__(self, query, key, value):
        if query is key and key is value:
            mode = "self"        # one (rows,E)@(E,3E) projection push
        elif key is value:
            mode = "kv"          # q push + packed (E,2E) KV push
        else:
            mode = "general"     # three column-sliced pushes
        return mha_forward(mode, query, key, value, self.w_qkv, self.b_qkv,
                           self.wo, self.bo, self.num_heads)


# ---------------------------------------------------------------------------
# Pure-JAX reference (same effective parameters) for a correctness check.
# ---------------------------------------------------------------------------
def reference_forward(mha, query, key, value):
    B, Sq, E = query.shape
    H, Dh = mha.num_heads, mha.head_dim
    w = mha.w_qkv.astype(jnp.float32)
    b = mha.b_qkv[0]
    wq, wk, wv = w[:, :E], w[:, E:2 * E], w[:, 2 * E:]
    bq, bk, bv = b[:E], b[E:2 * E], b[2 * E:]

    q = (query @ wq + bq).reshape(B, Sq, H, Dh).transpose(0, 2, 1, 3)
    k = (key @ wk + bk).reshape(B, -1, H, Dh).transpose(0, 2, 1, 3)
    v = (value @ wv + bv).reshape(B, -1, H, Dh).transpose(0, 2, 1, 3)
    # 1/sqrt(Dh) is already folded into wq/bq, so no extra scaling here.
    s = jnp.einsum('bhqd,bhkd->bhqk', q, k)
    p = jax.nn.softmax(s, axis=-1)
    ctx = jnp.einsum('bhqk,bhkd->bhqd', p, v)
    ctx = ctx.transpose(0, 2, 1, 3).reshape(B, Sq, E)
    return ctx @ mha.wo.astype(jnp.float32) + mha.bo[0]


# ---------------------------------------------------------------------------
if __name__ == "__main__":
    B, S, E, H = 2, 8, 32, 4

    root = jax.random.PRNGKey(0)
    k_param, k_q, k_k, k_v = jax.random.split(root, 4)

    mha = MultiHeadAttentionPallas(E, H, k_param)

    query = jax.random.normal(k_q, (B, S, E), dtype=jnp.float32)
    key = jax.random.normal(k_k, (B, S, E), dtype=jnp.float32)
    value = jax.random.normal(k_v, (B, S, E), dtype=jnp.float32)

    # General path: q / k / v all distinct.
    out = mha(query, key, value)
    jax.block_until_ready(out)
    assert out.shape == (B, S, E)
    ref = reference_forward(mha, query, key, value)
    assert jnp.allclose(out, ref, atol=2e-2, rtol=2e-2), \
        float(jnp.max(jnp.abs(out - ref)))

    # Shared-KV path (key is value): two projection pushes.
    out_kv = mha(query, key, key)
    ref_kv = reference_forward(mha, query, key, key)
    assert jnp.allclose(out_kv, ref_kv, atol=2e-2, rtol=2e-2), \
        float(jnp.max(jnp.abs(out_kv - ref_kv)))

    # Self-attention path: single fused (rows, E) @ (E, 3E) projection push.
    out_self = mha(query, query, query)
    ref_self = reference_forward(mha, query, query, query)
    assert jnp.allclose(out_self, ref_self, atol=2e-2, rtol=2e-2), \
        float(jnp.max(jnp.abs(out_self - ref_self)))

    print("KERNEL_OK")
</pallas_src>

<mosaic_0001>
module attributes {stable_mosaic.version = 11 : i64} {
  func.func @kernel(%arg0: i32, %arg1: memref<16x32xf32, #tpu.memory_space<vmem>>, %arg2: memref<16x32xf32, #tpu.memory_space<vmem>>, %arg3: memref<16x32xf32, #tpu.memory_space<vmem>>, %arg4: memref<32x96xbf16, #tpu.memory_space<vmem>>, %arg5: memref<1x96xf32, #tpu.memory_space<vmem>>, %arg6: memref<32x32xbf16, #tpu.memory_space<vmem>>, %arg7: memref<1x32xf32, #tpu.memory_space<vmem>>, %arg8: memref<16x32xf32, #tpu.memory_space<vmem>>) attributes {dimension_semantics = [#tpu.dimension_semantics<parallel>], iteration_bounds = array<i64: 1>, scalar_prefetch = 0 : i64, scratch_operands = 0 : i64, tpu.core_type = #tpu.core_type<tc>, window_params = [{transform_indices = @transform_0, window_bounds = array<i64: 16, 32>}, {transform_indices = @transform_1, window_bounds = array<i64: 16, 32>}, {transform_indices = @transform_2, window_bounds = array<i64: 16, 32>}, {pipeline_mode = #tpu.pipeline_mode<synchronous>, transform_indices = @transform_3, window_bounds = array<i64: 32, 96>}, {pipeline_mode = #tpu.pipeline_mode<synchronous>, transform_indices = @transform_4, window_bounds = array<i64: 1, 96>}, {pipeline_mode = #tpu.pipeline_mode<synchronous>, transform_indices = @transform_5, window_bounds = array<i64: 32, 32>}, {pipeline_mode = #tpu.pipeline_mode<synchronous>, transform_indices = @transform_6, window_bounds = array<i64: 1, 32>}, {transform_indices = @transform_7, window_bounds = array<i64: 16, 32>}]} {
    %c0 = arith.constant 0 : index
    %c0_0 = arith.constant 0 : index
    %0 = vector.load %arg1[%c0, %c0_0] : memref<16x32xf32, #tpu.memory_space<vmem>>, vector<16x32xf32>
    %1 = arith.truncf %0 : vector<16x32xf32> to vector<16x32xbf16>
    %c0_1 = arith.constant 0 : index
    %c0_2 = arith.constant 0 : index
    %2 = vector.load %arg2[%c0_1, %c0_2] : memref<16x32xf32, #tpu.memory_space<vmem>>, vector<16x32xf32>
    %3 = arith.truncf %2 : vector<16x32xf32> to vector<16x32xbf16>
    %c0_3 = arith.constant 0 : index
    %c0_4 = arith.constant 0 : index
    %4 = vector.load %arg3[%c0_3, %c0_4] : memref<16x32xf32, #tpu.memory_space<vmem>>, vector<16x32xf32>
    %5 = arith.truncf %4 : vector<16x32xf32> to vector<16x32xbf16>
    %c0_5 = arith.constant 0 : index
    %c0_6 = arith.constant 0 : index
    %6 = vector.load %arg4[%c0_5, %c0_6] : memref<32x96xbf16, #tpu.memory_space<vmem>>, vector<32x96xbf16>
    %c0_7 = arith.constant 0 : index
    %c0_8 = arith.constant 0 : index
    %7 = vector.load %arg5[%c0_7, %c0_8] : memref<1x96xf32, #tpu.memory_space<vmem>>, vector<1x96xf32>
    %8 = vector.extract_strided_slice %6 {offsets = [0, 0], sizes = [32, 32], strides = [1, 1]} : vector<32x96xbf16> to vector<32x32xbf16>
    %cst = arith.constant dense<0.000000e+00> : vector<16x32xf32>
    %9 = tpu.matmul %1, %8, %cst {dimension_numbers = #tpu.dot_dimension_numbers<[1], [0], [0], [1], [0, 0, 1, 1], [], []>} : vector<16x32xbf16>, vector<32x32xbf16>, vector<16x32xf32> -> vector<16x32xf32>
    %10 = vector.extract_strided_slice %7 {offsets = [0, 0], sizes = [1, 32], strides = [1, 1]} : vector<1x96xf32> to vector<1x32xf32>
    %11 = vector.broadcast %10 : vector<1x32xf32> to vector<16x32xf32>
    %12 = arith.addf %9, %11 : vector<16x32xf32>
    %13 = vector.extract_strided_slice %6 {offsets = [0, 32], sizes = [32, 32], strides = [1, 1]} : vector<32x96xbf16> to vector<32x32xbf16>
    %cst_9 = arith.constant dense<0.000000e+00> : vector<16x32xf32>
    %14 = tpu.matmul %3, %13, %cst_9 {dimension_numbers = #tpu.dot_dimension_numbers<[1], [0], [0], [1], [0, 0, 1, 1], [], []>} : vector<16x32xbf16>, vector<32x32xbf16>, vector<16x32xf32> -> vector<16x32xf32>
    %15 = vector.extract_strided_slice %7 {offsets = [0, 32], sizes = [1, 32], strides = [1, 1]} : vector<1x96xf32> to vector<1x32xf32>
    %16 = vector.broadcast %15 : vector<1x32xf32> to vector<16x32xf32>
    %17 = arith.addf %14, %16 : vector<16x32xf32>
    %18 = vector.extract_strided_slice %6 {offsets = [0, 64], sizes = [32, 32], strides = [1, 1]} : vector<32x96xbf16> to vector<32x32xbf16>
    %cst_10 = arith.constant dense<0.000000e+00> : vector<16x32xf32>
    %19 = tpu.matmul %5, %18, %cst_10 {dimension_numbers = #tpu.dot_dimension_numbers<[1], [0], [0], [1], [0, 0, 1, 1], [], []>} : vector<16x32xbf16>, vector<32x32xbf16>, vector<16x32xf32> -> vector<16x32xf32>
    %20 = vector.extract_strided_slice %7 {offsets = [0, 64], sizes = [1, 32], strides = [1, 1]} : vector<1x96xf32> to vector<1x32xf32>
    %21 = vector.broadcast %20 : vector<1x32xf32> to vector<16x32xf32>
    %22 = arith.addf %19, %21 : vector<16x32xf32>
    %c0_11 = arith.constant 0 : index
    %c0_12 = arith.constant 0 : index
    %23 = vector.load %arg6[%c0_11, %c0_12] : memref<32x32xbf16, #tpu.memory_space<vmem>>, vector<32x32xbf16>
    %c0_13 = arith.constant 0 : index
    %c0_14 = arith.constant 0 : index
    %24 = vector.load %arg7[%c0_13, %c0_14] : memref<1x32xf32, #tpu.memory_space<vmem>>, vector<1x32xf32>
    %cst_15 = arith.constant 0.000000e+00 : f32
    %25 = vector.broadcast %cst_15 : f32 to vector<8x32xf32>
    %26 = vector.extract_strided_slice %12 {offsets = [0, 0], sizes = [8, 8], strides = [1, 1]} : vector<16x32xf32> to vector<8x8xf32>
    %27 = arith.truncf %26 : vector<8x8xf32> to vector<8x8xbf16>
    %28 = vector.extract_strided_slice %17 {offsets = [0, 0], sizes = [8, 8], strides = [1, 1]} : vector<16x32xf32> to vector<8x8xf32>
    %29 = arith.truncf %28 : vector<8x8xf32> to vector<8x8xbf16>
    %30 = vector.extract_strided_slice %22 {offsets = [0, 0], sizes = [8, 8], strides = [1, 1]} : vector<16x32xf32> to vector<8x8xf32>
    %31 = arith.truncf %30 : vector<8x8xf32> to vector<8x8xbf16>
    %cst_16 = arith.constant dense<0.000000e+00> : vector<8x8xf32>
    %32 = tpu.matmul %27, %29, %cst_16 {dimension_numbers = #tpu.dot_dimension_numbers<[1], [1], [0], [0], [0, 0, 1, 0], [], []>} : vector<8x8xbf16>, vector<8x8xbf16>, vector<8x8xf32> -> vector<8x8xf32>
    %cst_17 = arith.constant dense<0xFF800000> : vector<8xf32>
    %33 = vector.multi_reduction <maximumf>, %32, %cst_17 [1] : vector<8x8xf32> to vector<8xf32>
    %34 = vector.shape_cast %33 : vector<8xf32> to vector<8x1xf32>
    %35 = vector.broadcast %34 : vector<8x1xf32> to vector<8x8xf32>
    %36 = arith.subf %32, %35 : vector<8x8xf32>
    %37 = math.exp %36 : vector<8x8xf32>
    %cst_18 = arith.constant dense<0.000000e+00> : vector<8xf32>
    %38 = vector.multi_reduction <add>, %37, %cst_18 [1] : vector<8x8xf32> to vector<8xf32>
    %39 = vector.shape_cast %38 : vector<8xf32> to vector<8x1xf32>
    %40 = tpu.reciprocal %39 {approx = true} : vector<8x1xf32> -> vector<8x1xf32>
    %41 = vector.broadcast %40 : vector<8x1xf32> to vector<8x8xf32>
    %42 = arith.mulf %37, %41 : vector<8x8xf32>
    %43 = arith.truncf %42 : vector<8x8xf32> to vector<8x8xbf16>
    %cst_19 = arith.constant dense<0.000000e+00> : vector<8x8xf32>
    %44 = tpu.matmul %43, %31, %cst_19 {dimension_numbers = #tpu.dot_dimension_numbers<[1], [0], [0], [1], [0, 0, 1, 1], [], []>} : vector<8x8xbf16>, vector<8x8xbf16>, vector<8x8xf32> -> vector<8x8xf32>
    %45 = arith.truncf %44 : vector<8x8xf32> to vector<8x8xbf16>
    %46 = vector.extract_strided_slice %23 {offsets = [0, 0], sizes = [8, 32], strides = [1, 1]} : vector<32x32xbf16> to vector<8x32xbf16>
    %cst_20 = arith.constant dense<0.000000e+00> : vector<8x32xf32>
    %47 = tpu.matmul %45, %46, %cst_20 {dimension_numbers = #tpu.dot_dimension_numbers<[1], [0], [0], [1], [0, 0, 1, 1], [], []>} : vector<8x8xbf16>, vector<8x32xbf16>, vector<8x32xf32> -> vector<8x32xf32>
    %48 = arith.addf %25, %47 : vector<8x32xf32>
    %49 = vector.extract_strided_slice %12 {offsets = [0, 8], sizes = [8, 8], strides = [1, 1]} : vector<16x32xf32> to vector<8x8xf32>
    %50 = arith.truncf %49 : vector<8x8xf32> to vector<8x8xbf16>
    %51 = vector.extract_strided_slice %17 {offsets = [0, 8], sizes = [8, 8], strides = [1, 1]} : vector<16x32xf32> to vector<8x8xf32>
    %52 = arith.truncf %51 : vector<8x8xf32> to vector<8x8xbf16>
    %53 = vector.extract_strided_slice %22 {offsets = [0, 8], sizes = [8, 8], strides = [1, 1]} : vector<16x32xf32> to vector<8x8xf32>
    %54 = arith.truncf %53 : vector<8x8xf32> to vector<8x8xbf16>
    %cst_21 = arith.constant dense<0.000000e+00> : vector<8x8xf32>
    %55 = tpu.matmul %50, %52, %cst_21 {dimension_numbers = #tpu.dot_dimension_numbers<[1], [1], [0], [0], [0, 0, 1, 0], [], []>} : vector<8x8xbf16>, vector<8x8xbf16>, vector<8x8xf32> -> vector<8x8xf32>
    %cst_22 = arith.constant dense<0xFF800000> : vector<8xf32>
    %56 = vector.multi_reduction <maximumf>, %55, %cst_22 [1] : vector<8x8xf32> to vector<8xf32>
    %57 = vector.shape_cast %56 : vector<8xf32> to vector<8x1xf32>
    %58 = vector.broadcast %57 : vector<8x1xf32> to vector<8x8xf32>
    %59 = arith.subf %55, %58 : vector<8x8xf32>
    %60 = math.exp %59 : vector<8x8xf32>
    %cst_23 = arith.constant dense<0.000000e+00> : vector<8xf32>
    %61 = vector.multi_reduction <add>, %60, %cst_23 [1] : vector<8x8xf32> to vector<8xf32>
    %62 = vector.shape_cast %61 : vector<8xf32> to vector<8x1xf32>
    %63 = tpu.reciprocal %62 {approx = true} : vector<8x1xf32> -> vector<8x1xf32>
    %64 = vector.broadcast %63 : vector<8x1xf32> to vector<8x8xf32>
    %65 = arith.mulf %60, %64 : vector<8x8xf32>
    %66 = arith.truncf %65 : vector<8x8xf32> to vector<8x8xbf16>
    %cst_24 = arith.constant dense<0.000000e+00> : vector<8x8xf32>
    %67 = tpu.matmul %66, %54, %cst_24 {dimension_numbers = #tpu.dot_dimension_numbers<[1], [0], [0], [1], [0, 0, 1, 1], [], []>} : vector<8x8xbf16>, vector<8x8xbf16>, vector<8x8xf32> -> vector<8x8xf32>
    %68 = arith.truncf %67 : vector<8x8xf32> to vector<8x8xbf16>
    %69 = vector.extract_strided_slice %23 {offsets = [8, 0], sizes = [8, 32], strides = [1, 1]} : vector<32x32xbf16> to vector<8x32xbf16>
    %cst_25 = arith.constant dense<0.000000e+00> : vector<8x32xf32>
    %70 = tpu.matmul %68, %69, %cst_25 {dimension_numbers = #tpu.dot_dimension_numbers<[1], [0], [0], [1], [0, 0, 1, 1], [], []>} : vector<8x8xbf16>, vector<8x32xbf16>, vector<8x32xf32> -> vector<8x32xf32>
    %71 = arith.addf %48, %70 : vector<8x32xf32>
    %72 = vector.extract_strided_slice %12 {offsets = [0, 16], sizes = [8, 8], strides = [1, 1]} : vector<16x32xf32> to vector<8x8xf32>
    %73 = arith.truncf %72 : vector<8x8xf32> to vector<8x8xbf16>
    %74 = vector.extract_strided_slice %17 {offsets = [0, 16], sizes = [8, 8], strides = [1, 1]} : vector<16x32xf32> to vector<8x8xf32>
    %75 = arith.truncf %74 : vector<8x8xf32> to vector<8x8xbf16>
    %76 = vector.extract_strided_slice %22 {offsets = [0, 16], sizes = [8, 8], strides = [1, 1]} : vector<16x32xf32> to vector<8x8xf32>
    %77 = arith.truncf %76 : vector<8x8xf32> to vector<8x8xbf16>
    %cst_26 = arith.constant dense<0.000000e+00> : vector<8x8xf32>
    %78 = tpu.matmul %73, %75, %cst_26 {dimension_numbers = #tpu.dot_dimension_numbers<[1], [1], [0], [0], [0, 0, 1, 0], [], []>} : vector<8x8xbf16>, vector<8x8xbf16>, vector<8x8xf32> -> vector<8x8xf32>
    %cst_27 = arith.constant dense<0xFF800000> : vector<8xf32>
    %79 = vector.multi_reduction <maximumf>, %78, %cst_27 [1] : vector<8x8xf32> to vector<8xf32>
    %80 = vector.shape_cast %79 : vector<8xf32> to vector<8x1xf32>
    %81 = vector.broadcast %80 : vector<8x1xf32> to vector<8x8xf32>
    %82 = arith.subf %78, %81 : vector<8x8xf32>
    %83 = math.exp %82 : vector<8x8xf32>
    %cst_28 = arith.constant dense<0.000000e+00> : vector<8xf32>
    %84 = vector.multi_reduction <add>, %83, %cst_28 [1] : vector<8x8xf32> to vector<8xf32>
    %85 = vector.shape_cast %84 : vector<8xf32> to vector<8x1xf32>
    %86 = tpu.reciprocal %85 {approx = true} : vector<8x1xf32> -> vector<8x1xf32>
    %87 = vector.broadcast %86 : vector<8x1xf32> to vector<8x8xf32>
    %88 = arith.mulf %83, %87 : vector<8x8xf32>
    %89 = arith.truncf %88 : vector<8x8xf32> to vector<8x8xbf16>
    %cst_29 = arith.constant dense<0.000000e+00> : vector<8x8xf32>
    %90 = tpu.matmul %89, %77, %cst_29 {dimension_numbers = #tpu.dot_dimension_numbers<[1], [0], [0], [1], [0, 0, 1, 1], [], []>} : vector<8x8xbf16>, vector<8x8xbf16>, vector<8x8xf32> -> vector<8x8xf32>
    %91 = arith.truncf %90 : vector<8x8xf32> to vector<8x8xbf16>
    %92 = vector.extract_strided_slice %23 {offsets = [16, 0], sizes = [8, 32], strides = [1, 1]} : vector<32x32xbf16> to vector<8x32xbf16>
    %cst_30 = arith.constant dense<0.000000e+00> : vector<8x32xf32>
    %93 = tpu.matmul %91, %92, %cst_30 {dimension_numbers = #tpu.dot_dimension_numbers<[1], [0], [0], [1], [0, 0, 1, 1], [], []>} : vector<8x8xbf16>, vector<8x32xbf16>, vector<8x32xf32> -> vector<8x32xf32>
    %94 = arith.addf %71, %93 : vector<8x32xf32>
    %95 = vector.extract_strided_slice %12 {offsets = [0, 24], sizes = [8, 8], strides = [1, 1]} : vector<16x32xf32> to vector<8x8xf32>
    %96 = arith.truncf %95 : vector<8x8xf32> to vector<8x8xbf16>
    %97 = vector.extract_strided_slice %17 {offsets = [0, 24], sizes = [8, 8], strides = [1, 1]} : vector<16x32xf32> to vector<8x8xf32>
    %98 = arith.truncf %97 : vector<8x8xf32> to vector<8x8xbf16>
    %99 = vector.extract_strided_slice %22 {offsets = [0, 24], sizes = [8, 8], strides = [1, 1]} : vector<16x32xf32> to vector<8x8xf32>
    %100 = arith.truncf %99 : vector<8x8xf32> to vector<8x8xbf16>
    %cst_31 = arith.constant dense<0.000000e+00> : vector<8x8xf32>
    %101 = tpu.matmul %96, %98, %cst_31 {dimension_numbers = #tpu.dot_dimension_numbers<[1], [1], [0], [0], [0, 0, 1, 0], [], []>} : vector<8x8xbf16>, vector<8x8xbf16>, vector<8x8xf32> -> vector<8x8xf32>
    %cst_32 = arith.constant dense<0xFF800000> : vector<8xf32>
    %102 = vector.multi_reduction <maximumf>, %101, %cst_32 [1] : vector<8x8xf32> to vector<8xf32>
    %103 = vector.shape_cast %102 : vector<8xf32> to vector<8x1xf32>
    %104 = vector.broadcast %103 : vector<8x1xf32> to vector<8x8xf32>
    %105 = arith.subf %101, %104 : vector<8x8xf32>
    %106 = math.exp %105 : vector<8x8xf32>
    %cst_33 = arith.constant dense<0.000000e+00> : vector<8xf32>
    %107 = vector.multi_reduction <add>, %106, %cst_33 [1] : vector<8x8xf32> to vector<8xf32>
    %108 = vector.shape_cast %107 : vector<8xf32> to vector<8x1xf32>
    %109 = tpu.reciprocal %108 {approx = true} : vector<8x1xf32> -> vector<8x1xf32>
    %110 = vector.broadcast %109 : vector<8x1xf32> to vector<8x8xf32>
    %111 = arith.mulf %106, %110 : vector<8x8xf32>
    %112 = arith.truncf %111 : vector<8x8xf32> to vector<8x8xbf16>
    %cst_34 = arith.constant dense<0.000000e+00> : vector<8x8xf32>
    %113 = tpu.matmul %112, %100, %cst_34 {dimension_numbers = #tpu.dot_dimension_numbers<[1], [0], [0], [1], [0, 0, 1, 1], [], []>} : vector<8x8xbf16>, vector<8x8xbf16>, vector<8x8xf32> -> vector<8x8xf32>
    %114 = arith.truncf %113 : vector<8x8xf32> to vector<8x8xbf16>
    %115 = vector.extract_strided_slice %23 {offsets = [24, 0], sizes = [8, 32], strides = [1, 1]} : vector<32x32xbf16> to vector<8x32xbf16>
    %cst_35 = arith.constant dense<0.000000e+00> : vector<8x32xf32>
    %116 = tpu.matmul %114, %115, %cst_35 {dimension_numbers = #tpu.dot_dimension_numbers<[1], [0], [0], [1], [0, 0, 1, 1], [], []>} : vector<8x8xbf16>, vector<8x32xbf16>, vector<8x32xf32> -> vector<8x32xf32>
    %117 = arith.addf %94, %116 : vector<8x32xf32>
    %118 = vector.broadcast %24 : vector<1x32xf32> to vector<8x32xf32>
    %119 = arith.addf %117, %118 : vector<8x32xf32>
    %c0_36 = arith.constant 0 : index
    %c0_37 = arith.constant 0 : index
    %120 = vector.load %arg8[%c0_36, %c0_37] : memref<16x32xf32, #tpu.memory_space<vmem>>, vector<8x32xf32>
    tpu.vector_store %arg8[%c0_36, %c0_37], %119 {strides = array<i32>} : memref<16x32xf32, #tpu.memory_space<vmem>>, vector<8x32xf32>,
    %cst_38 = arith.constant 0.000000e+00 : f32
    %121 = vector.broadcast %cst_38 : f32 to vector<8x32xf32>
    %122 = vector.extract_strided_slice %12 {offsets = [8, 0], sizes = [8, 8], strides = [1, 1]} : vector<16x32xf32> to vector<8x8xf32>
    %123 = arith.truncf %122 : vector<8x8xf32> to vector<8x8xbf16>
    %124 = vector.extract_strided_slice %17 {offsets = [8, 0], sizes = [8, 8], strides = [1, 1]} : vector<16x32xf32> to vector<8x8xf32>
    %125 = arith.truncf %124 : vector<8x8xf32> to vector<8x8xbf16>
    %126 = vector.extract_strided_slice %22 {offsets = [8, 0], sizes = [8, 8], strides = [1, 1]} : vector<16x32xf32> to vector<8x8xf32>
    %127 = arith.truncf %126 : vector<8x8xf32> to vector<8x8xbf16>
    %cst_39 = arith.constant dense<0.000000e+00> : vector<8x8xf32>
    %128 = tpu.matmul %123, %125, %cst_39 {dimension_numbers = #tpu.dot_dimension_numbers<[1], [1], [0], [0], [0, 0, 1, 0], [], []>} : vector<8x8xbf16>, vector<8x8xbf16>, vector<8x8xf32> -> vector<8x8xf32>
    %cst_40 = arith.constant dense<0xFF800000> : vector<8xf32>
    %129 = vector.multi_reduction <maximumf>, %128, %cst_40 [1] : vector<8x8xf32> to vector<8xf32>
    %130 = vector.shape_cast %129 : vector<8xf32> to vector<8x1xf32>
    %131 = vector.broadcast %130 : vector<8x1xf32> to vector<8x8xf32>
    %132 = arith.subf %128, %131 : vector<8x8xf32>
    %133 = math.exp %132 : vector<8x8xf32>
    %cst_41 = arith.constant dense<0.000000e+00> : vector<8xf32>
    %134 = vector.multi_reduction <add>, %133, %cst_41 [1] : vector<8x8xf32> to vector<8xf32>
    %135 = vector.shape_cast %134 : vector<8xf32> to vector<8x1xf32>
    %136 = tpu.reciprocal %135 {approx = true} : vector<8x1xf32> -> vector<8x1xf32>
    %137 = vector.broadcast %136 : vector<8x1xf32> to vector<8x8xf32>
    %138 = arith.mulf %133, %137 : vector<8x8xf32>
    %139 = arith.truncf %138 : vector<8x8xf32> to vector<8x8xbf16>
    %cst_42 = arith.constant dense<0.000000e+00> : vector<8x8xf32>
    %140 = tpu.matmul %139, %127, %cst_42 {dimension_numbers = #tpu.dot_dimension_numbers<[1], [0], [0], [1], [0, 0, 1, 1], [], []>} : vector<8x8xbf16>, vector<8x8xbf16>, vector<8x8xf32> -> vector<8x8xf32>
    %141 = arith.truncf %140 : vector<8x8xf32> to vector<8x8xbf16>
    %142 = vector.extract_strided_slice %23 {offsets = [0, 0], sizes = [8, 32], strides = [1, 1]} : vector<32x32xbf16> to vector<8x32xbf16>
    %cst_43 = arith.constant dense<0.000000e+00> : vector<8x32xf32>
    %143 = tpu.matmul %141, %142, %cst_43 {dimension_numbers = #tpu.dot_dimension_numbers<[1], [0], [0], [1], [0, 0, 1, 1], [], []>} : vector<8x8xbf16>, vector<8x32xbf16>, vector<8x32xf32> -> vector<8x32xf32>
    %144 = arith.addf %121, %143 : vector<8x32xf32>
    %145 = vector.extract_strided_slice %12 {offsets = [8, 8], sizes = [8, 8], strides = [1, 1]} : vector<16x32xf32> to vector<8x8xf32>
    %146 = arith.truncf %145 : vector<8x8xf32> to vector<8x8xbf16>
    %147 = vector.extract_strided_slice %17 {offsets = [8, 8], sizes = [8, 8], strides = [1, 1]} : vector<16x32xf32> to vector<8x8xf32>
    %148 = arith.truncf %147 : vector<8x8xf32> to vector<8x8xbf16>
    %149 = vector.extract_strided_slice %22 {offsets = [8, 8], sizes = [8, 8], strides = [1, 1]} : vector<16x32xf32> to vector<8x8xf32>
    %150 = arith.truncf %149 : vector<8x8xf32> to vector<8x8xbf16>
    %cst_44 = arith.constant dense<0.000000e+00> : vector<8x8xf32>
    %151 = tpu.matmul %146, %148, %cst_44 {dimension_numbers = #tpu.dot_dimension_numbers<[1], [1], [0], [0], [0, 0, 1, 0], [], []>} : vector<8x8xbf16>, vector<8x8xbf16>, vector<8x8xf32> -> vector<8x8xf32>
    %cst_45 = arith.constant dense<0xFF800000> : vector<8xf32>
    %152 = vector.multi_reduction <maximumf>, %151, %cst_45 [1] : vector<8x8xf32> to vector<8xf32>
    %153 = vector.shape_cast %152 : vector<8xf32> to vector<8x1xf32>
    %154 = vector.broadcast %153 : vector<8x1xf32> to vector<8x8xf32>
    %155 = arith.subf %151, %154 : vector<8x8xf32>
    %156 = math.exp %155 : vector<8x8xf32>
    %cst_46 = arith.constant dense<0.000000e+00> : vector<8xf32>
    %157 = vector.multi_reduction <add>, %156, %cst_46 [1] : vector<8x8xf32> to vector<8xf32>
    %158 = vector.shape_cast %157 : vector<8xf32> to vector<8x1xf32>
    %159 = tpu.reciprocal %158 {approx = true} : vector<8x1xf32> -> vector<8x1xf32>
    %160 = vector.broadcast %159 : vector<8x1xf32> to vector<8x8xf32>
    %161 = arith.mulf %156, %160 : vector<8x8xf32>
    %162 = arith.truncf %161 : vector<8x8xf32> to vector<8x8xbf16>
    %cst_47 = arith.constant dense<0.000000e+00> : vector<8x8xf32>
    %163 = tpu.matmul %162, %150, %cst_47 {dimension_numbers = #tpu.dot_dimension_numbers<[1], [0], [0], [1], [0, 0, 1, 1], [], []>} : vector<8x8xbf16>, vector<8x8xbf16>, vector<8x8xf32> -> vector<8x8xf32>
    %164 = arith.truncf %163 : vector<8x8xf32> to vector<8x8xbf16>
    %165 = vector.extract_strided_slice %23 {offsets = [8, 0], sizes = [8, 32], strides = [1, 1]} : vector<32x32xbf16> to vector<8x32xbf16>
    %cst_48 = arith.constant dense<0.000000e+00> : vector<8x32xf32>
    %166 = tpu.matmul %164, %165, %cst_48 {dimension_numbers = #tpu.dot_dimension_numbers<[1], [0], [0], [1], [0, 0, 1, 1], [], []>} : vector<8x8xbf16>, vector<8x32xbf16>, vector<8x32xf32> -> vector<8x32xf32>
    %167 = arith.addf %144, %166 : vector<8x32xf32>
    %168 = vector.extract_strided_slice %12 {offsets = [8, 16], sizes = [8, 8], strides = [1, 1]} : vector<16x32xf32> to vector<8x8xf32>
    %169 = arith.truncf %168 : vector<8x8xf32> to vector<8x8xbf16>
    %170 = vector.extract_strided_slice %17 {offsets = [8, 16], sizes = [8, 8], strides = [1, 1]} : vector<16x32xf32> to vector<8x8xf32>
    %171 = arith.truncf %170 : vector<8x8xf32> to vector<8x8xbf16>
    %172 = vector.extract_strided_slice %22 {offsets = [8, 16], sizes = [8, 8], strides = [1, 1]} : vector<16x32xf32> to vector<8x8xf32>
    %173 = arith.truncf %172 : vector<8x8xf32> to vector<8x8xbf16>
    %cst_49 = arith.constant dense<0.000000e+00> : vector<8x8xf32>
    %174 = tpu.matmul %169, %171, %cst_49 {dimension_numbers = #tpu.dot_dimension_numbers<[1], [1], [0], [0], [0, 0, 1, 0], [], []>} : vector<8x8xbf16>, vector<8x8xbf16>, vector<8x8xf32> -> vector<8x8xf32>
    %cst_50 = arith.constant dense<0xFF800000> : vector<8xf32>
    %175 = vector.multi_reduction <maximumf>, %174, %cst_50 [1] : vector<8x8xf32> to vector<8xf32>
    %176 = vector.shape_cast %175 : vector<8xf32> to vector<8x1xf32>
    %177 = vector.broadcast %176 : vector<8x1xf32> to vector<8x8xf32>
    %178 = arith.subf %174, %177 : vector<8x8xf32>
    %179 = math.exp %178 : vector<8x8xf32>
    %cst_51 = arith.constant dense<0.000000e+00> : vector<8xf32>
    %180 = vector.multi_reduction <add>, %179, %cst_51 [1] : vector<8x8xf32> to vector<8xf32>
    %181 = vector.shape_cast %180 : vector<8xf32> to vector<8x1xf32>
    %182 = tpu.reciprocal %181 {approx = true} : vector<8x1xf32> -> vector<8x1xf32>
    %183 = vector.broadcast %182 : vector<8x1xf32> to vector<8x8xf32>
    %184 = arith.mulf %179, %183 : vector<8x8xf32>
    %185 = arith.truncf %184 : vector<8x8xf32> to vector<8x8xbf16>
    %cst_52 = arith.constant dense<0.000000e+00> : vector<8x8xf32>
    %186 = tpu.matmul %185, %173, %cst_52 {dimension_numbers = #tpu.dot_dimension_numbers<[1], [0], [0], [1], [0, 0, 1, 1], [], []>} : vector<8x8xbf16>, vector<8x8xbf16>, vector<8x8xf32> -> vector<8x8xf32>
    %187 = arith.truncf %186 : vector<8x8xf32> to vector<8x8xbf16>
    %188 = vector.extract_strided_slice %23 {offsets = [16, 0], sizes = [8, 32], strides = [1, 1]} : vector<32x32xbf16> to vector<8x32xbf16>
    %cst_53 = arith.constant dense<0.000000e+00> : vector<8x32xf32>
    %189 = tpu.matmul %187, %188, %cst_53 {dimension_numbers = #tpu.dot_dimension_numbers<[1], [0], [0], [1], [0, 0, 1, 1], [], []>} : vector<8x8xbf16>, vector<8x32xbf16>, vector<8x32xf32> -> vector<8x32xf32>
    %190 = arith.addf %167, %189 : vector<8x32xf32>
    %191 = vector.extract_strided_slice %12 {offsets = [8, 24], sizes = [8, 8], strides = [1, 1]} : vector<16x32xf32> to vector<8x8xf32>
    %192 = arith.truncf %191 : vector<8x8xf32> to vector<8x8xbf16>
    %193 = vector.extract_strided_slice %17 {offsets = [8, 24], sizes = [8, 8], strides = [1, 1]} : vector<16x32xf32> to vector<8x8xf32>
    %194 = arith.truncf %193 : vector<8x8xf32> to vector<8x8xbf16>
    %195 = vector.extract_strided_slice %22 {offsets = [8, 24], sizes = [8, 8], strides = [1, 1]} : vector<16x32xf32> to vector<8x8xf32>
    %196 = arith.truncf %195 : vector<8x8xf32> to vector<8x8xbf16>
    %cst_54 = arith.constant dense<0.000000e+00> : vector<8x8xf32>
    %197 = tpu.matmul %192, %194, %cst_54 {dimension_numbers = #tpu.dot_dimension_numbers<[1], [1], [0], [0], [0, 0, 1, 0], [], []>} : vector<8x8xbf16>, vector<8x8xbf16>, vector<8x8xf32> -> vector<8x8xf32>
    %cst_55 = arith.constant dense<0xFF800000> : vector<8xf32>
    %198 = vector.multi_reduction <maximumf>, %197, %cst_55 [1] : vector<8x8xf32> to vector<8xf32>
    %199 = vector.shape_cast %198 : vector<8xf32> to vector<8x1xf32>
    %200 = vector.broadcast %199 : vector<8x1xf32> to vector<8x8xf32>
    %201 = arith.subf %197, %200 : vector<8x8xf32>
    %202 = math.exp %201 : vector<8x8xf32>
    %cst_56 = arith.constant dense<0.000000e+00> : vector<8xf32>
    %203 = vector.multi_reduction <add>, %202, %cst_56 [1] : vector<8x8xf32> to vector<8xf32>
    %204 = vector.shape_cast %203 : vector<8xf32> to vector<8x1xf32>
    %205 = tpu.reciprocal %204 {approx = true} : vector<8x1xf32> -> vector<8x1xf32>
    %206 = vector.broadcast %205 : vector<8x1xf32> to vector<8x8xf32>
    %207 = arith.mulf %202, %206 : vector<8x8xf32>
    %208 = arith.truncf %207 : vector<8x8xf32> to vector<8x8xbf16>
    %cst_57 = arith.constant dense<0.000000e+00> : vector<8x8xf32>
    %209 = tpu.matmul %208, %196, %cst_57 {dimension_numbers = #tpu.dot_dimension_numbers<[1], [0], [0], [1], [0, 0, 1, 1], [], []>} : vector<8x8xbf16>, vector<8x8xbf16>, vector<8x8xf32> -> vector<8x8xf32>
    %210 = arith.truncf %209 : vector<8x8xf32> to vector<8x8xbf16>
    %211 = vector.extract_strided_slice %23 {offsets = [24, 0], sizes = [8, 32], strides = [1, 1]} : vector<32x32xbf16> to vector<8x32xbf16>
    %cst_58 = arith.constant dense<0.000000e+00> : vector<8x32xf32>
    %212 = tpu.matmul %210, %211, %cst_58 {dimension_numbers = #tpu.dot_dimension_numbers<[1], [0], [0], [1], [0, 0, 1, 1], [], []>} : vector<8x8xbf16>, vector<8x32xbf16>, vector<8x32xf32> -> vector<8x32xf32>
    %213 = arith.addf %190, %212 : vector<8x32xf32>
    %214 = vector.broadcast %24 : vector<1x32xf32> to vector<8x32xf32>
    %215 = arith.addf %213, %214 : vector<8x32xf32>
    %c8 = arith.constant 8 : index
    %c0_59 = arith.constant 0 : index
    %216 = vector.load %arg8[%c8, %c0_59] : memref<16x32xf32, #tpu.memory_space<vmem>>, vector<8x32xf32>
    tpu.vector_store %arg8[%c8, %c0_59], %215 {strides = array<i32>} : memref<16x32xf32, #tpu.memory_space<vmem>>, vector<8x32xf32>,
    return
  }
  func.func @transform_0(%arg0: i32) -> (i32, i32) {
    %c0_i32 = arith.constant 0 : i32
    %c0_i32_0 = arith.constant 0 : i32
    return %arg0, %c0_i32 : i32, i32
  }
  func.func @transform_1(%arg0: i32) -> (i32, i32) {
    %c0_i32 = arith.constant 0 : i32
    %c0_i32_0 = arith.constant 0 : i32
    return %arg0, %c0_i32 : i32, i32
  }
  func.func @transform_2(%arg0: i32) -> (i32, i32) {
    %c0_i32 = arith.constant 0 : i32
    %c0_i32_0 = arith.constant 0 : i32
    return %arg0, %c0_i32 : i32, i32
  }
  func.func @transform_3(%arg0: i32) -> (i32, i32) {
    %c0_i32 = arith.constant 0 : i32
    %c0_i32_0 = arith.constant 0 : i32
    %c0_i32_1 = arith.constant 0 : i32
    return %c0_i32, %c0_i32_0 : i32, i32
  }
  func.func @transform_4(%arg0: i32) -> (i32, i32) {
    %c0_i32 = arith.constant 0 : i32
    %c0_i32_0 = arith.constant 0 : i32
    %c0_i32_1 = arith.constant 0 : i32
    return %c0_i32, %c0_i32_0 : i32, i32
  }
  func.func @transform_5(%arg0: i32) -> (i32, i32) {
    %c0_i32 = arith.constant 0 : i32
    %c0_i32_0 = arith.constant 0 : i32
    %c0_i32_1 = arith.constant 0 : i32
    return %c0_i32, %c0_i32_0 : i32, i32
  }
  func.func @transform_6(%arg0: i32) -> (i32, i32) {
    %c0_i32 = arith.constant 0 : i32
    %c0_i32_0 = arith.constant 0 : i32
    %c0_i32_1 = arith.constant 0 : i32
    return %c0_i32, %c0_i32_0 : i32, i32
  }
  func.func @transform_7(%arg0: i32) -> (i32, i32) {
    %c0_i32 = arith.constant 0 : i32
    %c0_i32_0 = arith.constant 0 : i32
    return %arg0, %c0_i32 : i32, i32
  }
}

</mosaic_0001>

<bundles_post_ra>
// kernel: tpu_custom_call.1
= control target key start
LH: loop header
LB: loop body
LE: loop exit
PB: predicated region body
PF: predicated region fallthrough
CT: control target
= control target key end

     0   :  { %12 = vsyncpa [#allocation3], 0  ;;  %s1318_s0 = inlined_call_operand.hbm [shape: f32[16,32], index: 0, kind: input, shape index: {}]   ;;  %s1319_s1 = inlined_call_operand.hbm [shape: f32[16,32], index: 1, kind: input, shape index: {}]   ;;  %s1320_s2 = inlined_call_operand.hbm [shape: f32[16,32], index: 2, kind: input, shape index: {}]   ;;  %s1321_s3 = inlined_call_operand.hbm [shape: bf16[32,96], index: 3, kind: input, shape index: {}]   ;;  %s1322_s4 = inlined_call_operand.vmem [shape: f32[1,96], index: 4, kind: input, shape index: {}]   ;;  %s1323_s5 = inlined_call_operand.hbm [shape: bf16[32,32], index: 5, kind: input, shape index: {}]   ;;  %s1324_s6 = inlined_call_operand.vmem [shape: f32[1,32], index: 6, kind: input, shape index: {}]   ;;  %s1325_s7 = inlined_call_operand.hbm [shape: f32[16,32], index: 7, kind: output, shape index: {}]  }
   0x1   :  { %13 = vsyncpa [#allocation6], 0 }
   0x2   :  { %14 = vsyncpa [#allocation9], 0 }
   0x3   :  { %15 = vsyncpa [#allocation4], 0  ;;  %s33_s26 = sshll.u32 %s1319_s1, 4  ;;  %s1077_s27 = smov [#allocation5]   ;;  %s34_s26 = int_to_ptr.hbm [resolvable:$true] %s33_s26 }
   0x4   :  { %s35_s28 = sshll.u32 %s1077_s27, 4  ;;  %s59_s8 = sshll.u32 %s1321_s3, 4  ;;  %s36_s28 = int_to_ptr.vmem [resolvable:$true] %s35_s28  ;;  %s60_s8 = int_to_ptr.hbm [resolvable:$true] %s59_s8 }
   0x5   :  { %s1078_s9 = smov 128   ;;  %s1079_s10 = smov 8  }
   0x6   :  { %41 = dma.hbm_to_vmem [thread:$0]  %s34_s26, 256, %s36_s28, [#allocation6], %s1078_s9, %s1078_s9, %s1079_s10  }
   0x7   :  { %s1080_s11 = smov [#allocation8]   ;;  %s1081_s13 = smov 64  }
   0x8   :  { %s61_s12 = sshll.u32 %s1080_s11, 4  ;;  %s1082_s1 = smov 4   ;;  %s62_s12 = int_to_ptr.vmem [resolvable:$true] %s61_s12 }
   0x9   :  { %67 = dma.hbm_to_vmem [thread:$0]  %s60_s8, 256, %s62_s12, [#allocation9], %s1081_s13, %s1081_s13, %s1082_s1  }
   0xa   :  { %s20_s16 = sshll.u32 %s1318_s0, 4  ;;  %s1083_s3 = smov [#allocation2]   ;;  %s21_s16 = int_to_ptr.hbm [resolvable:$true] %s20_s16 }
   0xb   :  { %s22_s17 = sshll.u32 %s1083_s3, 4  ;;  %s46_s20 = sshll.u32 %s1320_s2, 4  ;;  %s23_s17 = int_to_ptr.vmem [resolvable:$true] %s22_s17  ;;  %s47_s20 = int_to_ptr.hbm [resolvable:$true] %s46_s20 }
   0xc   :  { %28 = dma.hbm_to_vmem [thread:$0]  %s21_s16, 256, %s23_s17, [#allocation3], %s1078_s9, %s1078_s9, %s1079_s10  }
   0xd   :  { %s1084_s21 = smov [#allocation7]   ;;  %s74_s25 = sshll.u32 %s1323_s5, 4  ;;  %s75_s25 = int_to_ptr.hbm [resolvable:$true] %s74_s25 }
   0xe   :  { %s48_s22 = sshll.u32 %s1084_s21, 4  ;;  %s1085_s0 = smov [#allocation10]   ;;  %s49_s22 = int_to_ptr.vmem [resolvable:$true] %s48_s22 }
   0xf   :  { %54 = dma.hbm_to_vmem [thread:$0]  %s47_s20, 256, %s49_s22, [#allocation6], %s1078_s9, %s1078_s9, %s1079_s10  }
  0x10   :  { %s76_s26 = sshll.u32 %s1085_s0, 4  ;;  %s77_s26 = int_to_ptr.vmem [resolvable:$true] %s76_s26 }
  0x11   :  { %82 = dma.hbm_to_vmem [thread:$0]  %s75_s25, 256, %s77_s26, [#allocation9], %s1081_s13, %s1081_s13, %s1082_s1  }
  0x12   :  { %1069 = dma.done.wait [#allocation3], 256  }
  0x13   :  { %1070 = vsyncadd [#allocation3], 4294967040 }
  0x14   :  { %1071 = dma.done.wait [#allocation6], 512  }
  0x15   :  { %1072 = vsyncadd [#allocation6], 4294966784 }
  0x16   :  { %1073 = dma.done.wait [#allocation9], 512  }
  0x17   :  { %1074 = vsyncadd [#allocation9], 4294966784  ;;  %v876_v0 = vld [vmem:[#allocation8 + $0x8] sm:$0xff]  ;;  %s1086_s2 = smov 96   ;;  %v875_v1 = vld [vmem:[#allocation8] sm:$0xff]  ;;  %vm135_vm0 = vcmask 261120  }
  0x18   :  { %155 = vrot.lane.b32.xlu0 %v876_v0, %s1086_s2  ;;  %145 = vmatpush.bf16.msra.mxu0 %v876_v0  ;;  %v106_v2 = vld [vmem:[#allocation2] sm:$0xff]  ;;  %v107_v3 = vld [vmem:[#allocation2 + $0x8] sm:$0xff]  ;;  %v109_v7 = vld [vmem:[#allocation5] sm:$0xff]  ;;  %s1087_s28 = smov 120   ;;  %vm213_vm1 = vcmask 64512   ;;  %s1089_s29 = smov 104  }
  0x19   :  { %v108_v4 = vpack.c.bf16 %v107_v3, %v106_v2  ;;  %v1163_v5 = vld [vmem:[%s1322_s4] ss:$0 sm:$0xff]  ;;  %v110_v8 = vld [vmem:[#allocation5 + $0x8] sm:$0xff]  ;;  %s1088_s4 = smov 112   ;;  %v113_v26 = vld [vmem:[#allocation7 + $0x8] sm:$0xff]  ;;  %vm248_vm2 = vcmask 1043456  }
  0x1a   :  { %159 = vrot.lane.b32.xlu1 %v1163_v5, %s1086_s2  ;;  %v111_v10 = vpack.c.bf16 %v110_v8, %v109_v7  ;;  %v112_v25 = vld [vmem:[#allocation7] sm:$0xff]  ;;  %s825_s1 = sshll.u32 %s1325_s7, 4  ;;  %s826_s1 = int_to_ptr.hbm [resolvable:$true] %s825_s1 }
  0x1b   :  { %v114_v28 = vpack.c.bf16 %v113_v26, %v112_v25  ;;  %v206_v7 = vld [vmem:[#allocation10 + $0x4] sm:$0xf] }
  0x1c   :  { %146 = vmatpush.bf16.msra.mxu0 %v875_v1  ;;  %v330_v8 = vsel %vm248_vm2, %v206_v7, 0 }
  0x1f   :  { %848 = vmatmul.msk.bf16.vlgmr.msra.gmra.mxu0 %vm135_vm0, %v108_v4 }
  0x20   :  { %153 = vrot.lane.b32.xlu0 %v875_v1, %s1086_s2 }
  0x8a   :  { %v156_v6 = vpop.permute.xlu0 %155 }
  0x8b   :  { %171 = vmatpush.bf16.msra.mxu1 %v156_v6 }
  0x8c   :  { %v1174_v14 = vpop.permute.xlu1 %159 }
  0x92   :  { %v154_v9 = vpop.permute.xlu0 %153 }
  0x93   :  { %172 = vmatpush.bf16.msra.mxu1 %v154_v9 }
  0x96   :  { %849 = vmatmul.msk.bf16.vlgmr.msra.gmra.mxu1 %vm135_vm0, %v111_v10 }
  0x9c   :  { %v148_v11 = vpop.f32.mrf.mxu0 }
  0x9d   :  { %v149_v12 = vadd.f32 %v1163_v5, %v148_v11  ;;  %v207_v11 = vld [vmem:[#allocation10 + $0x8] sm:$0xf] }
  0x9f   :  { %v1168_v13 = vpack.c.bf16 %v149_v12, %v149_v12  ;;  %v425_v12 = vsel %vm248_vm2, %v207_v11, 0 }
  0xa1   :  { %267 = vrot.lane.b32.xlu2 %v1168_v13, %s1087_s28  ;;  %364 = vrot.lane.b32.xlu0 %v1168_v13, %s1088_s4 }
  0xfb   :  { %v268_v19 = vpop.permute.xlu2 %267 }
 0x113   :  { %v174_v15 = vpop.f32.mrf.mxu1  ;;  %v365_v29 = vpop.permute.xlu0 %364 }
 0x114   :  { %v175_v16 = vadd.f32 %v174_v15, %v1174_v14  ;;  %v205_v15 = vld [vmem:[#allocation10] sm:$0xf] }
 0x116   :  { %v211_v17 = vpack.c.bf16 %v175_v16, %v175_v16  ;;  %v349_v16 = vsel %vm248_vm2, %v205_v15, 0 }
 0x118   :  { %270 = vrot.lane.b32.xlu1 %v211_v17, %s1087_s28  ;;  %366 = vrot.lane.b32.xlu2 %v211_v17, %s1088_s4  ;;  %v218_v18 = vsel %vm213_vm1, %v211_v17, 0 }
 0x119   :  { %227 = vmatpush.bf16.xpose.msra.mxu3 %v218_v18 }
 0x11b   :  { %v1191_v32 = vpop.f32.mrf.mxu1 }
 0x11c   :  { %v177_v18 = vadd.f32 %v1191_v32, %v1174_v14 }
 0x120   :  { %181 = vrot.lane.b32.xlu1 %v876_v0, %s1081_s13  ;;  %851 = vmatmul.msk.bf16.vlgmr.msra.gmra.mxu3 %vm213_vm1, %v1168_v13 }
 0x121   :  { %179 = vrot.lane.b32.xlu2 %v875_v1, %s1081_s13  ;;  %339 = vmatpush.bf16.msrb.mxu3 %v330_v8 }
 0x125   :  { %434 = vmatpush.bf16.msra.mxu3 %v425_v12 }
 0x129   :  { %185 = vrot.lane.b32.xlu2 %v1163_v5, %s1081_s13 }
 0x172   :  { %v367_v20 = vpop.permute.xlu2 %366 }
 0x173   :  { %v372_v23 = vsel %vm213_vm1, %v367_v20, 0 }
 0x17b   :  { %v180_v27 = vpop.permute.xlu2 %179 }
 0x183   :  { %v1194_v36 = vpop.permute.xlu2 %185 }
 0x18a   :  { %v271_v21 = vpop.permute.xlu1 %270 }
 0x18b   :  { %v276_v22 = vsel %vm213_vm1, %v271_v21, 0 }
 0x18c   :  { %285 = vmatpush.bf16.xpose.msrb.mxu1 %v276_v22 }
 0x192   :  { %v182_v24 = vpop.permute.xlu1 %181 }
 0x193   :  { %853 = vmatmul.msk.bf16.vlgmr.msrb.gmra.mxu1 %vm213_vm1, %v268_v19  ;;  %197 = vmatpush.bf16.msra.mxu2 %v182_v24  ;;  %v1222_v19 = vpack.c.bf16 %v177_v18, %v177_v18 }
 0x194   :  { %381 = vmatpush.bf16.xpose.msra.mxu1 %v372_v23 }
 0x197   :  { %198 = vmatpush.bf16.msra.mxu2 %v180_v27 }
 0x19a   :  { %850 = vmatmul.msk.bf16.vlgmr.msra.gmra.mxu2 %vm135_vm0, %v114_v28 }
 0x1a3   :  { %857 = vmatmul.msk.bf16.vlgmr.msra.gmra.mxu1 %vm213_vm1, %v365_v29  ;;  %v229_v30 = vpop.f32.mrf.mxu3 }
 0x1a4   :  { %v233_v54 = vsel %vm213_vm1, %v229_v30, -inf }
 0x1ab   :  { %v231_v31 = vpop.f32.mrf.mxu3 }
 0x1ac   :  { %v150_v31 = vpop.f32.mrf.mxu0 }
 0x1ad   :  { %v151_v32 = vadd.f32 %v1163_v5, %v150_v31 }
 0x210   :  { %v287_v33 = vpop.f32.mrf.mxu1 }
 0x211   :  { %v291_v34 = vsel %vm213_vm1, %v287_v33, -inf }
 0x212   :  { %292 = vmax.xlane.f32.xlu0 %v291_v34 }
 0x218   :  { %v289_v35 = vpop.f32.mrf.mxu1 }
 0x21d   :  { %v200_v37 = vpop.f32.mrf.mxu2 }
 0x21e   :  { %v201_v38 = vadd.f32 %v200_v37, %v1194_v36 }
 0x220   :  { %v383_v39 = vpop.f32.mrf.mxu1  ;;  %v1198_v41 = vpack.c.bf16 %v201_v38, %v201_v38 }
 0x221   :  { %v387_v40 = vsel %vm213_vm1, %v383_v39, -inf }
 0x222   :  { %388 = vmax.xlane.f32.xlu1 %v387_v40  ;;  %v250_v46 = vsel %vm248_vm2, %v1198_v41, 0 }
 0x223   :  { %259 = vmatpush.bf16.msrb.mxu0 %v250_v46 }
 0x226   :  { %304 = vrot.lane.b32.xlu0 %v1198_v41, %s1087_s28 }
 0x227   :  { %358 = vmatpush.bf16.msra.mxu0 %v349_v16 }
 0x228   :  { %v385_v42 = vpop.f32.mrf.mxu1 }
 0x22e   :  { %443 = vrot.lane.b32.xlu0 %v211_v17, %s1089_s29  ;;  %v202_v17 = vpop.f32.mrf.mxu2 }
 0x22f   :  { %v203_v35 = vadd.f32 %v202_v17, %v1194_v36 }
 0x231   :  { %v1235_v38 = vpack.c.bf16 %v203_v35, %v203_v35 }
 0x233   :  { %v561_v42 = vsel %vm248_vm2, %v1235_v38, 0 }
 0x285   :  { %v293_v43 = vpop.xlane.xlu0 %292 }
 0x286   :  { %v294_v44 = vsub.f32 %v287_v33, %v293_v43  ;;  %v523_v33 = vpack.c.bf16 %v151_v32, %v151_v32 }
 0x288   :  { %v295_v45 = vmul.f32 1.442695, %v294_v44 }
 0x28a   :  { %893 = vpow2.f32 %v295_v45 }
 0x290   :  { %v894_v47 = vpop.eup %893 }
 0x291   :  { %v297_v48 = vsel %vm213_vm1, %v894_v47, 0.0 }
 0x292   :  { %298 = vadd.xlane.f32.xlu2 %v297_v48 }
 0x295   :  { %v389_v49 = vpop.xlane.xlu1 %388 }
 0x296   :  { %v390_v50 = vsub.f32 %v383_v39, %v389_v49 }
 0x298   :  { %v391_v51 = vmul.f32 1.442695, %v390_v50  ;;  %v305_v55 = vpop.permute.xlu0 %304 }
 0x299   :  { %v310_v56 = vsel %vm248_vm2, %v305_v55, 0 }
 0x29a   :  { %895 = vpow2.f32 %v391_v51  ;;  %319 = vmatpush.bf16.msrb.mxu2 %v310_v56 }
 0x2a0   :  { %v896_v52 = vpop.eup %895  ;;  %v444_v28 = vpop.permute.xlu0 %443 }
 0x2a1   :  { %v393_v53 = vsel %vm213_vm1, %v896_v52, 0.0  ;;  %v449_v29 = vsel %vm213_vm1, %v444_v28, 0 }
 0x2a2   :  { %394 = vadd.xlane.f32.xlu1 %v393_v53 }
 0x2aa   :  { %234 = vmax.xlane.f32.xlu1 %v233_v54  ;;  %399 = vrot.lane.b32.xlu2 %v1198_v41, %s1088_s4 }
 0x305   :  { %v299_v57 = vpop.xlane.xlu2 %298 }
 0x306   :  { %897 = vrcp.f32 %v299_v57 }
 0x30c   :  { %v898_v58 = vpop.eup %897 }
 0x30d   :  { %v301_v59 = vmul.f32 %v898_v58, %v894_v47  ;;  %v400_v60 = vpop.permute.xlu2 %399 }
 0x30e   :  { %v405_v61 = vsel %vm248_vm2, %v400_v60, 0 }
 0x30f   :  { %v302_v62 = vpack.c.bf16 %v301_v59, %v301_v59  ;;  %414 = vmatpush.bf16.msra.mxu2 %v405_v61 }
 0x311   :  { %854 = vmatmul.msk.bf16.vlgmr.msrb.gmra.mxu2 %vm213_vm1, %v302_v62 }
 0x315   :  { %v395_v63 = vpop.xlane.xlu1 %394 }
 0x316   :  { %899 = vrcp.f32 %v395_v63 }
 0x31c   :  { %v900_v0 = vpop.eup %899 }
 0x31d   :  { %v397_v1 = vmul.f32 %v900_v0, %v896_v52  ;;  %v235_v2 = vpop.xlane.xlu1 %234 }
 0x31e   :  { %v236_v3 = vsub.f32 %v229_v30, %v235_v2 }
 0x31f   :  { %v398_v4 = vpack.c.bf16 %v397_v1, %v397_v1 }
 0x320   :  { %v237_v6 = vmul.f32 1.442695, %v236_v3 }
 0x321   :  { %858 = vmatmul.msk.bf16.vlgmr.msra.gmra.mxu2 %vm213_vm1, %v398_v4 }
 0x322   :  { %901 = vpow2.f32 %v237_v6 }
 0x328   :  { %v902_v9 = vpop.eup %901 }
 0x329   :  { %v239_v10 = vsel %vm213_vm1, %v902_v9, 0.0 }
 0x32a   :  { %240 = vadd.xlane.f32.xlu1 %v239_v10 }
 0x343   :  { %441 = vrot.lane.b32.xlu1 %v1168_v13, %s1089_s29  ;;  %v530_v13 = vsel %vm213_vm1, %v1222_v19, 0 }
 0x394   :  { %v321_v20 = vpop.f32.mrf.mxu2 }
 0x395   :  { %v325_v21 = vpack.c.bf16 %v321_v20, %v321_v20 }
 0x397   :  { %855 = vmatmul.msk.bf16.vlgmr.msrb.gmra.mxu3 %vm213_vm1, %v325_v21 }
 0x398   :  { %539 = vmatpush.bf16.xpose.msrb.mxu3 %v530_v13 }
 0x39c   :  { %v323_v22 = vpop.f32.mrf.mxu2 }
 0x39d   :  { %v241_v23 = vpop.xlane.xlu1 %240  ;;  %v208_v22 = vld [vmem:[#allocation10 + $0xc] sm:$0xf] }
 0x39e   :  { %903 = vrcp.f32 %v241_v23  ;;  %v1271_v23 = vsel %vm248_vm2, %v208_v22, 0 }
 0x39f   :  { %511 = vmatpush.bf16.msrb.mxu2 %v1271_v23 }
 0x3a4   :  { %v904_v24 = vpop.eup %903  ;;  %v416_v25 = vpop.f32.mrf.mxu2 }
 0x3a5   :  { %v243_v26 = vmul.f32 %v904_v24, %v902_v9  ;;  %v420_v27 = vpack.c.bf16 %v416_v25, %v416_v25 }
 0x3a7   :  { %859 = vmatmul.msk.bf16.vlgmr.msra.gmra.mxu3 %vm213_vm1, %v420_v27  ;;  %v244_v14 = vpack.c.bf16 %v243_v26, %v243_v26 }
 0x3a8   :  { %647 = vmatpush.bf16.msra.mxu3 %v330_v8 }
 0x3a9   :  { %852 = vmatmul.msk.bf16.vlgmr.msrb.gmra.mxu0 %vm213_vm1, %v244_v14 }
 0x3aa   :  { %458 = vmatpush.bf16.xpose.msrb.mxu0 %v449_v29 }
 0x3ac   :  { %v418_v30 = vpop.f32.mrf.mxu2 }
 0x3b5   :  { %v442_v45 = vpop.permute.xlu1 %441 }
 0x3b7   :  { %863 = vmatmul.msk.bf16.vlgmr.msrb.gmra.mxu3 %vm213_vm1, %v523_v33 }
 0x3b8   :  { %736 = vmatpush.bf16.msrb.mxu3 %v425_v12 }
 0x41a   :  { %v1232_v34 = vpop.f32.mrf.mxu3 }
 0x422   :  { %v343_v37 = vpop.f32.mrf.mxu3 }
 0x426   :  { %v261_v39 = vpop.f32.mrf.mxu0 }
 0x427   :  { %v265_v40 = vpack.c.bf16 %v261_v39, %v261_v39 }
 0x429   :  { %856 = vmatmul.msk.bf16.vlgmr.msra.gmra.mxu0 %vm213_vm1, %v265_v40 }
 0x42a   :  { %570 = vmatpush.bf16.msra.mxu0 %v561_v42  ;;  %v1240_v5 = vpop.f32.mrf.mxu3 }
 0x42e   :  { %v263_v43 = vpop.f32.mrf.mxu0 }
 0x432   :  { %v438_v44 = vpop.f32.mrf.mxu3 }
 0x433   :  { %v1288_v44 = vld [vmem:[%s1324_s6] ss:$0 sm:$0xff]  ;;  %s1090_s6 = smov [#allocation11]  }
 0x434   :  { %s823_s11 = sshll.u32 %s1090_s6, 4  ;;  %s824_s11 = int_to_ptr.vmem [resolvable:$true] %s823_s11 }
 0x439   :  { %860 = vmatmul.msk.bf16.vlgmr.msrb.gmra.mxu0 %vm213_vm1, %v442_v45 }
 0x43a   :  { %v541_v46 = vpop.f32.mrf.mxu3  ;;  %663 = vmatpush.bf16.msrb.mxu0 %v349_v16 }
 0x43b   :  { %v545_v36 = vsel %vm213_vm1, %v541_v46, -inf }
 0x43c   :  { %546 = vmax.xlane.f32.xlu0 %v545_v36 }
 0x442   :  { %v543_v47 = vpop.f32.mrf.mxu3 }
 0x4a6   :  { %v1244_v48 = vpop.f32.mrf.mxu0 }
 0x4a7   :  { %v361_v40 = vadd.f32 %v1244_v48, %v1232_v34 }
 0x4a9   :  { %v440_v43 = vadd.f32 %v1240_v5, %v361_v40 }
 0x4ae   :  { %v362_v49 = vpop.f32.mrf.mxu0 }
 0x4af   :  { %v547_v50 = vpop.xlane.xlu0 %546 }
 0x4b0   :  { %v548_v51 = vsub.f32 %v541_v46, %v547_v50 }
 0x4b2   :  { %v549_v52 = vmul.f32 1.442695, %v548_v51 }
 0x4b4   :  { %905 = vpow2.f32 %v549_v52 }
 0x4b6   :  { %v460_v53 = vpop.f32.mrf.mxu0 }
 0x4b7   :  { %v464_v54 = vsel %vm213_vm1, %v460_v53, -inf }
 0x4b8   :  { %465 = vmax.xlane.f32.xlu1 %v464_v54 }
 0x4ba   :  { %v906_v55 = vpop.eup %905 }
 0x4bb   :  { %v551_v56 = vsel %vm213_vm1, %v906_v55, 0.0 }
 0x4bc   :  { %552 = vadd.xlane.f32.xlu2 %v551_v56 }
 0x4be   :  { %v462_v57 = vpop.f32.mrf.mxu0 }
 0x4d1   :  { %578 = vrot.lane.b32.xlu1 %v523_v33, %s1087_s28 }
 0x4d4   :  { %476 = vrot.lane.b32.xlu2 %v1198_v41, %s1089_s29 }
 0x4dc   :  { %671 = vrot.lane.b32.xlu2 %v1222_v19, %s1088_s4 }
 0x4e4   :  { %669 = vrot.lane.b32.xlu2 %v523_v33, %s1088_s4 }
 0x52b   :  { %v466_v58 = vpop.xlane.xlu1 %465 }
 0x52c   :  { %v467_v59 = vsub.f32 %v460_v53, %v466_v58 }
 0x52e   :  { %v468_v60 = vmul.f32 1.442695, %v467_v59 }
 0x52f   :  { %v553_v61 = vpop.xlane.xlu2 %552 }
 0x530   :  { %907 = vpow2.f32 %v468_v60 }
 0x531   :  { %909 = vrcp.f32 %v553_v61 }
 0x536   :  { %v908_v62 = vpop.eup %907 }
 0x537   :  { %v910_v63 = vpop.eup %909  ;;  %v477_v0 = vpop.permute.xlu2 %476  ;;  %v470_v1 = vsel %vm213_vm1, %v908_v62, 0.0 }
 0x538   :  { %v555_v2 = vmul.f32 %v910_v63, %v906_v55  ;;  %v482_v3 = vsel %vm248_vm2, %v477_v0, 0  ;;  %471 = vadd.xlane.f32.xlu0 %v470_v1 }
 0x539   :  { %491 = vmatpush.bf16.msrb.mxu1 %v482_v3 }
 0x53a   :  { %v556_v41 = vpack.c.bf16 %v555_v2, %v555_v2 }
 0x53c   :  { %864 = vmatmul.msk.bf16.vlgmr.msra.gmra.mxu0 %vm213_vm1, %v556_v41 }
 0x53f   :  { %v672_v11 = vpop.permute.xlu2 %671 }
 0x540   :  { %v677_v16 = vsel %vm213_vm1, %v672_v11, 0 }
 0x543   :  { %v579_v18 = vpop.permute.xlu1 %578 }
 0x547   :  { %v670_v13 = vpop.permute.xlu2 %669 }
 0x54c   :  { %581 = vrot.lane.b32.xlu0 %v1222_v19, %s1087_s28 }
 0x554   :  { %745 = vrot.lane.b32.xlu0 %v1222_v19, %s1089_s29 }
 0x55c   :  { %743 = vrot.lane.b32.xlu0 %v523_v33, %s1089_s29 }
 0x5ab   :  { %v472_v4 = vpop.xlane.xlu0 %471 }
 0x5ac   :  { %911 = vrcp.f32 %v472_v4 }
 0x5b2   :  { %v912_v6 = vpop.eup %911 }
 0x5b3   :  { %v474_v7 = vmul.f32 %v912_v6, %v908_v62 }
 0x5b5   :  { %v475_v8 = vpack.c.bf16 %v474_v7, %v474_v7 }
 0x5b7   :  { %861 = vmatmul.msk.bf16.vlgmr.msrb.gmra.mxu1 %vm213_vm1, %v475_v8 }
 0x5b9   :  { %v572_v9 = vpop.f32.mrf.mxu0 }
 0x5ba   :  { %v576_v10 = vpack.c.bf16 %v572_v9, %v572_v9 }
 0x5bc   :  { %868 = vmatmul.msk.bf16.vlgmr.msrb.gmra.mxu0 %vm213_vm1, %v576_v10 }
 0x5be   :  { %v582_v12 = vpop.permute.xlu0 %581 }
 0x5bf   :  { %v587_v15 = vsel %vm213_vm1, %v582_v12, 0 }
 0x5c0   :  { %596 = vmatpush.bf16.xpose.msra.mxu1 %v587_v15 }
 0x5c1   :  { %v574_v17 = vpop.f32.mrf.mxu0 }
 0x5c6   :  { %v746_v19 = vpop.permute.xlu0 %745 }
 0x5c7   :  { %v751_v20 = vsel %vm213_vm1, %v746_v19, 0  ;;  %865 = vmatmul.msk.bf16.vlgmr.msra.gmra.mxu1 %vm213_vm1, %v579_v18 }
 0x5c8   :  { %686 = vmatpush.bf16.xpose.msrb.mxu1 %v677_v16  ;;  %760 = vmatpush.bf16.xpose.msra.mxu0 %v751_v20 }
 0x5ce   :  { %v744_v21 = vpop.permute.xlu0 %743 }
 0x5cf   :  { %872 = vmatmul.msk.bf16.vlgmr.msra.gmra.mxu0 %vm213_vm1, %v744_v21 }
 0x5d7   :  { %869 = vmatmul.msk.bf16.vlgmr.msrb.gmra.mxu1 %vm213_vm1, %v670_v13 }
 0x634   :  { %v493_v24 = vpop.f32.mrf.mxu1 }
 0x635   :  { %v497_v25 = vpack.c.bf16 %v493_v24, %v493_v24 }
 0x637   :  { %862 = vmatmul.msk.bf16.vlgmr.msrb.gmra.mxu2 %vm213_vm1, %v497_v25 }
 0x639   :  { %v1275_v26 = vpop.f32.mrf.mxu0 }
 0x63c   :  { %v495_v27 = vpop.f32.mrf.mxu1 }
 0x641   :  { %v667_v28 = vpop.f32.mrf.mxu0 }
 0x644   :  { %v598_v14 = vpop.f32.mrf.mxu1 }
 0x645   :  { %v602_v29 = vsel %vm213_vm1, %v598_v14, -inf }
 0x646   :  { %603 = vmax.xlane.f32.xlu2 %v602_v29 }
 0x64c   :  { %v600_v30 = vpop.f32.mrf.mxu1  ;;  %v762_v31 = vpop.f32.mrf.mxu0 }
 0x64d   :  { %v766_v32 = vsel %vm213_vm1, %v762_v31, -inf }
 0x64e   :  { %767 = vmax.xlane.f32.xlu1 %v766_v32 }
 0x654   :  { %v688_v33 = vpop.f32.mrf.mxu1  ;;  %v764_v35 = vpop.f32.mrf.mxu0 }
 0x655   :  { %v692_v37 = vsel %vm213_vm1, %v688_v33, -inf }
 0x656   :  { %693 = vmax.xlane.f32.xlu0 %v692_v37 }
 0x65c   :  { %v690_v39 = vpop.f32.mrf.mxu1 }
 0x66a   :  { %615 = vrot.lane.b32.xlu0 %v1235_v38, %s1087_s28 }
 0x6b9   :  { %v604_v42 = vpop.xlane.xlu2 %603 }
 0x6ba   :  { %v605_v45 = vsub.f32 %v598_v14, %v604_v42  ;;  %v513_v46 = vpop.f32.mrf.mxu2 }
 0x6bb   :  { %v517_v36 = vadd.f32 %v513_v46, %v440_v43 }
 0x6bc   :  { %v606_v47 = vmul.f32 1.442695, %v605_v45 }
 0x6bd   :  { %v521_v49 = vadd.f32 %v1288_v44, %v517_v36 }
 0x6be   :  { %913 = vpow2.f32 %v606_v47 }
 0x6bf   :  { %522 = vst.msk [vmem:[#allocation11] sm:$0xff] %vm135_vm0, %v521_v49 }
 0x6c1   :  { %v768_v50 = vpop.xlane.xlu1 %767 }
 0x6c2   :  { %v769_v51 = vsub.f32 %v762_v31, %v768_v50  ;;  %v515_v34 = vpop.f32.mrf.mxu2 }
 0x6c4   :  { %v914_v48 = vpop.eup %913  ;;  %v770_v52 = vmul.f32 1.442695, %v769_v51 }
 0x6c5   :  { %v608_v5 = vsel %vm213_vm1, %v914_v48, 0.0 }
 0x6c6   :  { %915 = vpow2.f32 %v770_v52  ;;  %609 = vadd.xlane.f32.xlu2 %v608_v5 }
 0x6c9   :  { %v694_v53 = vpop.xlane.xlu0 %693 }
 0x6ca   :  { %v695_v54 = vsub.f32 %v688_v33, %v694_v53 }
 0x6cc   :  { %v916_v55 = vpop.eup %915  ;;  %v696_v56 = vmul.f32 1.442695, %v695_v54 }
 0x6cd   :  { %v772_v57 = vsel %vm213_vm1, %v916_v55, 0.0 }
 0x6ce   :  { %917 = vpow2.f32 %v696_v56  ;;  %773 = vadd.xlane.f32.xlu2 %v772_v57 }
 0x6d4   :  { %v918_v58 = vpop.eup %917 }
 0x6d5   :  { %v698_v59 = vsel %vm213_vm1, %v918_v58, 0.0 }
 0x6d6   :  { %699 = vadd.xlane.f32.xlu1 %v698_v59 }
 0x6dc   :  { %v616_v60 = vpop.permute.xlu0 %615 }
 0x6dd   :  { %v621_v61 = vsel %vm248_vm2, %v616_v60, 0 }
 0x6de   :  { %630 = vmatpush.bf16.msra.mxu2 %v621_v61 }
 0x6e6   :  { %778 = vrot.lane.b32.xlu2 %v1235_v38, %s1089_s29 }
 0x6ef   :  { %704 = vrot.lane.b32.xlu1 %v1235_v38, %s1088_s4 }
 0x739   :  { %v610_v62 = vpop.xlane.xlu2 %609 }
 0x73a   :  { %919 = vrcp.f32 %v610_v62 }
 0x740   :  { %v920_v63 = vpop.eup %919 }
 0x741   :  { %v612_v0 = vmul.f32 %v920_v63, %v914_v48  ;;  %v774_v1 = vpop.xlane.xlu2 %773 }
 0x742   :  { %921 = vrcp.f32 %v774_v1 }
 0x743   :  { %v613_v2 = vpack.c.bf16 %v612_v0, %v612_v0 }
 0x745   :  { %866 = vmatmul.msk.bf16.vlgmr.msra.gmra.mxu2 %vm213_vm1, %v613_v2 }
 0x748   :  { %v922_v3 = vpop.eup %921 }
 0x749   :  { %v776_v41 = vmul.f32 %v922_v3, %v916_v55  ;;  %v779_v4 = vpop.permute.xlu2 %778  ;;  %v700_v8 = vpop.xlane.xlu1 %699 }
 0x74a   :  { %v784_v6 = vsel %vm248_vm2, %v779_v4, 0  ;;  %923 = vrcp.f32 %v700_v8 }
 0x74b   :  { %v777_v7 = vpack.c.bf16 %v776_v41, %v776_v41  ;;  %793 = vmatpush.bf16.msra.mxu1 %v784_v6 }
 0x74e   :  { %873 = vmatmul.msk.bf16.vlgmr.msra.gmra.mxu1 %vm213_vm1, %v777_v7 }
 0x750   :  { %v924_v38 = vpop.eup %923 }
 0x751   :  { %v702_v9 = vmul.f32 %v924_v38, %v918_v58 }
 0x753   :  { %v703_v12 = vpack.c.bf16 %v702_v9, %v702_v9 }
 0x761   :  { %v705_v10 = vpop.permute.xlu1 %704 }
 0x762   :  { %v710_v11 = vsel %vm248_vm2, %v705_v10, 0 }
 0x763   :  { %719 = vmatpush.bf16.msrb.mxu2 %v710_v11 }
 0x766   :  { %870 = vmatmul.msk.bf16.vlgmr.msrb.gmra.mxu2 %vm213_vm1, %v703_v12 }
 0x767   :  { %810 = vmatpush.bf16.msra.mxu2 %v1271_v23 }
 0x7c8   :  { %v632_v15 = vpop.f32.mrf.mxu2 }
 0x7c9   :  { %v636_v16 = vpack.c.bf16 %v632_v15, %v632_v15 }
 0x7cb   :  { %867 = vmatmul.msk.bf16.vlgmr.msra.gmra.mxu3 %vm213_vm1, %v636_v16  ;;  %v795_v17 = vpop.f32.mrf.mxu1 }
 0x7cc   :  { %v799_v18 = vpack.c.bf16 %v795_v17, %v795_v17 }
 0x7ce   :  { %874 = vmatmul.msk.bf16.vlgmr.msra.gmra.mxu2 %vm213_vm1, %v799_v18 }
 0x7d0   :  { %v634_v19 = vpop.f32.mrf.mxu2 }
 0x7d3   :  { %v797_v20 = vpop.f32.mrf.mxu1 }
 0x7e9   :  { %v721_v21 = vpop.f32.mrf.mxu2 }
 0x7ea   :  { %v725_v13 = vpack.c.bf16 %v721_v21, %v721_v21 }
 0x7ec   :  { %871 = vmatmul.msk.bf16.vlgmr.msrb.gmra.mxu3 %vm213_vm1, %v725_v13 }
 0x7f1   :  { %v723_v22 = vpop.f32.mrf.mxu2 }
 0x84e   :  { %v649_v24 = vpop.f32.mrf.mxu3 }
 0x84f   :  { %v666_v28 = vadd.f32 %v1275_v26, %v649_v24 }
 0x851   :  { %v812_v25 = vpop.f32.mrf.mxu2 }
 0x856   :  { %v651_v23 = vpop.f32.mrf.mxu3 }
 0x859   :  { %v814_v27 = vpop.f32.mrf.mxu2 }
 0x86f   :  { %v738_v14 = vpop.f32.mrf.mxu3 }
 0x870   :  { %v742_v29 = vadd.f32 %v738_v14, %v666_v28 }
 0x872   :  { %v816_v30 = vadd.f32 %v812_v25, %v742_v29 }
 0x874   :  { %v817_v31 = vadd.f32 %v1288_v44, %v816_v30 }
 0x876   :  { %818 = vst.msk [vmem:[#allocation11 + $0x8] sm:$0xff] %vm135_vm0, %v817_v31 }
 0x877   :  { %v740_v32 = vpop.f32.mrf.mxu3  ;;  %831 = dma.vmem_to_hbm [thread:$0]  %s824_s11, 256, %s826_s1, [#allocation4], %s1078_s9, %s1078_s9, %s1079_s10  }
 0x878   :  { %1075 = dma.done.wait [#allocation4], 256  }
 0x879   :  { %1076 = vsyncadd [#allocation4], 4294967040 }
 0x87a   :  { %836 = vsyncpa [#allocation3], 1 }
 0x87b   :  { %837 = vsyncpa [#allocation6], 1 }
 0x87c   :  { %838 = vsyncpa [#allocation9], 1 }
 0x87d   :  { %839 = vsyncpa [#allocation4], 1 }

</bundles_post_ra>
